<compile_context>
chip_gen: v5e
topology: v5e:2x2
jax: 0.10.0
libtpu: 0.0.40
codegen_flags: <defaults>
</compile_context>

<pallas_src>
import jax
import jax.numpy as jnp
from jax.experimental import pallas as pl
from jax.experimental.pallas import tpu as pltpu


# ---------------------------------------------------------------------------
# Fused kernel
# ---------------------------------------------------------------------------
def _pvae_fused_kernel(x_ref, m_ref, eps_ref,
                       ew1a_ref, ew1b_ref, eb1_ref, ew2_ref, eb2_ref,
                       dw1_ref, db1_ref, dw2_ref, db2_ref,
                       latent_ref, z_ref, recon_ref):
    tb, S, L = eps_ref.shape  # batch rows this step, samples per row, latent dim

    def mm(a, b):
        # MXU matmul with f32 accumulation.  Weights arrive already cast
        # (host-side) to the requested matmul dtype; only the activation operand
        # is cast here (a no-op in the f32 path).
        return jnp.dot(a.astype(b.dtype), b, preferred_element_type=jnp.float32)

    x = x_ref[...]
    m = m_ref[...]

    # ---- encoder: split-W1 form; concat([x*m, m], 1) is never materialized ----
    h = mm(x * m, ew1a_ref[...]) + mm(m, ew1b_ref[...])
    h = jnp.maximum(h + eb1_ref[...], 0.0)                       # ReLU (VPU, f32)
    latent = mm(h, ew2_ref[...]) + eb2_ref[...]                  # (tb, 2L)
    latent_ref[...] = latent.astype(latent_ref.dtype)

    # ---- reparameterized sampling (exp runs on the otherwise-idle EUP) ----
    mean = latent[:, :L]                                          # (tb, L)
    std = jnp.exp(latent[:, L:])                                  # (tb, L)
    z3 = mean[:, None, :] + eps_ref[...] * std[:, None, :]        # (tb, S, L)

    # Leading-dim merge (tb, S, L) -> (tb*S, L): S is a multiple of 8, so this is
    # sublane-aligned and free (replaces the old per-row slice + concat).
    zf = z3.reshape(tb * S, L)
    z_ref[...] = zf.astype(z_ref.dtype)

    # ---- decoder MLP over all tb*S sample rows as one large-M matmul ----
    h2 = jnp.maximum(mm(zf, dw1_ref[...]) + db1_ref[...], 0.0)    # (tb*S, H)
    rec = mm(h2, dw2_ref[...]) + db2_ref[...]                     # (tb*S, D)
    recon_ref[...] = rec.astype(recon_ref.dtype)


# ---------------------------------------------------------------------------
# VMEM accounting + tile selection (generation aware)
# ---------------------------------------------------------------------------
def _pad_block_bytes(shape, itemsize):
    """Bytes a block really occupies in VMEM: last dim rounded to 128 lanes,
    second-to-last to 8 sublanes."""
    shape = tuple(int(d) for d in shape)
    if len(shape) == 1:
        shape = (1,) + shape
    lead = 1
    for d in shape[:-2]:
        lead *= d
    sub = -(-shape[-2] // 8) * 8
    lane = -(-shape[-1] // 128) * 128
    return lead * sub * lane * itemsize


def _per_step_vmem_bytes(tb, D, H, L, S, w_itemsize):
    f32 = 4
    pad = _pad_block_bytes
    # Pipelined (double-buffered) input/output blocks.
    io_blocks = 2 * (2 * pad((tb, D), f32)               # x, mask
                     + pad((tb, S, L), f32)              # eps
                     + pad((tb, 2 * L), f32)             # latent
                     + pad((tb * S, L), f32)             # z
                     + pad((tb * S, D), f32))            # recon
    # Grid-invariant weight/bias blocks (still allocated double-buffered).
    weights = 2 * (2 * pad((D, H), w_itemsize) + pad((H, 2 * L), w_itemsize)
                   + pad((L, H), w_itemsize) + pad((H, D), w_itemsize)
                   + 2 * pad((1, H), f32) + pad((1, 2 * L), f32) + pad((1, D), f32))
    # In-kernel temporaries that may live in / spill to VMEM at large tiles.
    temps = (pad((tb, H), f32) + pad((tb, 2 * L), f32)
             + 2 * pad((tb * S, L), f32)                 # z3 + zf
             + pad((tb * S, H), f32)                     # h2
             + pad((tb * S, D), f32))                    # rec
    return io_blocks + weights + temps


def _vmem_capacity_bytes():
    try:
        return int(pltpu.get_tpu_info().vmem_capacity_bytes)
    except Exception:
        return 64 * 1024 * 1024   # conservative fallback: v7x per-TensorCore VMEM


def _pick_rows_per_step(B, per_step_bytes, vmem_budget):
    """Largest batch tile that (a) satisfies the (8,128) block rule, (b) fits the
    per-step VMEM budget, and (c) leaves >= 4 (else >= 2) grid steps when B
    permits, so v7x's two TensorCores both get work and the pipeline can overlap
    DMA with compute."""
    cands = [t for t in range(8, B + 1, 8) if B % t == 0]
    if not cands:
        return B                                  # tiny batch: whole-B tile, grid=(1,)
    fitting = [t for t in cands if per_step_bytes(t) <= vmem_budget] or [min(cands)]
    prefer4 = [t for t in fitting if B // t >= 4]
    prefer2 = [t for t in fitting if B // t >= 2]
    return max(prefer4 or prefer2 or fitting)


# ---------------------------------------------------------------------------
# Wrapper
# ---------------------------------------------------------------------------
def pvae_forward(x, mask, eps, params, *, rows_per_step=None,
                 matmul_dtype=jnp.bfloat16):
    """Fused PVAE forward. Returns (latent, z, recon) matching PVAE.forward.

    matmul_dtype: dtype of the MXU operands (weights cast once host-side,
    activations at the operand); accumulation is always f32.  Use jnp.float32
    for exact parity with the f32 reference.
    """
    B, D = x.shape
    Be, S, L = eps.shape
    assert Be == B
    H = params["enc_w1"].shape[1]
    assert params["enc_w1"].shape == (2 * D, H)
    assert params["enc_w2"].shape == (H, 2 * L)
    assert params["dec_w1"].shape == (L, H)
    assert params["dec_w2"].shape == (H, D)

    wdt = jnp.dtype(matmul_dtype) if matmul_dtype is not None else jnp.dtype(x.dtype)
    w_itemsize = wdt.itemsize

    vmem_cap = _vmem_capacity_bytes()
    per_step = lambda t: _per_step_vmem_bytes(t, D, H, L, S, w_itemsize)
    if rows_per_step is None:
        rows_per_step = _pick_rows_per_step(B, per_step, vmem_cap // 3)
    tb = rows_per_step
    assert B % tb == 0 and (tb == B or tb % 8 == 0), (B, tb)
    grid = (B // tb,)

    # Host-side weight prep: split encoder W1 (so concat([x*m, m]) is never formed)
    # and cast all weight matrices ONCE to the matmul dtype.
    w1a = params["enc_w1"][:D, :].astype(wdt)
    w1b = params["enc_w1"][D:, :].astype(wdt)
    ew2 = params["enc_w2"].astype(wdt)
    dw1 = params["dec_w1"].astype(wdt)
    dw2 = params["dec_w2"].astype(wdt)

    # Padded per-step VMEM estimate; raise the scoped limit when the default
    # (16 MiB on v5e, 32 MiB on v6e/v7x) would not fit.
    est_bytes = per_step(tb)
    compiler_kwargs = dict(dimension_semantics=("parallel",))
    if est_bytes > 12 * 1024 * 1024:
        compiler_kwargs["vmem_limit_bytes"] = int(
            min(0.9 * vmem_cap, max(2 * est_bytes, 32 * 1024 * 1024)))

    latent, z_flat, recon_flat = pl.pallas_call(
        _pvae_fused_kernel,
        out_shape=(
            jax.ShapeDtypeStruct((B, 2 * L), x.dtype),      # latent
            jax.ShapeDtypeStruct((B * S, L), x.dtype),      # z (flat sample rows)
            jax.ShapeDtypeStruct((B * S, D), x.dtype),      # recon (flat sample rows)
        ),
        grid=grid,
        in_specs=[
            pl.BlockSpec((tb, D), lambda i: (i, 0)),        # x
            pl.BlockSpec((tb, D), lambda i: (i, 0)),        # mask
            pl.BlockSpec((tb, S, L), lambda i: (i, 0, 0)),  # eps
            pl.BlockSpec((D, H), lambda i: (0, 0)),         # enc W1 (x*mask half)
            pl.BlockSpec((D, H), lambda i: (0, 0)),         # enc W1 (mask half)
            pl.BlockSpec((1, H), lambda i: (0, 0)),         # enc b1
            pl.BlockSpec((H, 2 * L), lambda i: (0, 0)),     # enc W2
            pl.BlockSpec((1, 2 * L), lambda i: (0, 0)),     # enc b2
            pl.BlockSpec((L, H), lambda i: (0, 0)),         # dec W1
            pl.BlockSpec((1, H), lambda i: (0, 0)),         # dec b1
            pl.BlockSpec((H, D), lambda i: (0, 0)),         # dec W2
            pl.BlockSpec((1, D), lambda i: (0, 0)),         # dec b2
        ],
        out_specs=(
            pl.BlockSpec((tb, 2 * L), lambda i: (i, 0)),
            pl.BlockSpec((tb * S, L), lambda i: (i, 0)),
            pl.BlockSpec((tb * S, D), lambda i: (i, 0)),
        ),
        compiler_params=pltpu.CompilerParams(**compiler_kwargs),
    )(x, mask, eps, w1a, w1b,
      params["enc_b1"], ew2, params["enc_b2"],
      dw1, params["dec_b1"], dw2, params["dec_b2"])

    # Free, contiguous reshapes back to the PyTorch-facing shapes.
    return latent, z_flat.reshape(B, S, L), recon_flat.reshape(B, S, D)


# ---------------------------------------------------------------------------
# Pure-JAX reference for correctness check
# ---------------------------------------------------------------------------
def pvae_forward_ref(x, mask, eps, params):
    xm = jnp.concatenate([x * mask, mask], axis=1)
    h = jnp.maximum(xm @ params["enc_w1"] + params["enc_b1"], 0.0)
    latent = h @ params["enc_w2"] + params["enc_b2"]
    L = latent.shape[1] // 2
    mean, std = latent[:, :L], jnp.exp(latent[:, L:])
    z = mean[:, None, :] + eps * std[:, None, :]
    B, S, _ = z.shape
    zf = z.reshape(B * S, L)
    h2 = jnp.maximum(zf @ params["dec_w1"] + params["dec_b1"], 0.0)
    recon = (h2 @ params["dec_w2"] + params["dec_b2"]).reshape(B, S, -1)
    return latent, z, recon


# ---------------------------------------------------------------------------
# Main
# ---------------------------------------------------------------------------
if __name__ == "__main__":
    B = 2            # batch
    D = 16           # input features (mask_size)
    H = 32           # hidden width
    L = 8            # latent dim (encoder outputs 2*L)
    S = 128          # num_samples (PVAE default)

    key = jax.random.PRNGKey(0)
    kx, km, ke, kp1, kp2, kp3, kp4 = jax.random.split(key, 7)

    x = jax.random.normal(kx, (B, D), dtype=jnp.float32)
    mask = (jax.random.uniform(km, (B, D)) > 0.5).astype(jnp.float32)
    # TODO(synk): PyTorch draws eps in-kernel via torch.randn; we pass it in for a
    # deterministic reference check (pltpu.stateful_normal could generate it in-kernel).
    eps = jax.random.normal(ke, (B, S, L), dtype=jnp.float32)

    # Deterministic parameter init (small scale keeps exp() well-behaved).
    params = {
        "enc_w1": 0.1 * jax.random.normal(kp1, (2 * D, H), dtype=jnp.float32),
        "enc_b1": jnp.zeros((1, H), dtype=jnp.float32),
        "enc_w2": 0.1 * jax.random.normal(kp2, (H, 2 * L), dtype=jnp.float32),
        "enc_b2": jnp.zeros((1, 2 * L), dtype=jnp.float32),
        "dec_w1": 0.1 * jax.random.normal(kp3, (L, H), dtype=jnp.float32),
        "dec_b1": jnp.zeros((1, H), dtype=jnp.float32),
        "dec_w2": 0.1 * jax.random.normal(kp4, (H, D), dtype=jnp.float32),
        "dec_b2": jnp.zeros((1, D), dtype=jnp.float32),
    }

    latent_r, z_r, recon_r = pvae_forward_ref(x, mask, eps, params)

    # Exact-parity path: f32 MXU operands.
    latent, z, recon = pvae_forward(x, mask, eps, params, matmul_dtype=jnp.float32)
    jax.block_until_ready((latent, z, recon))
    assert latent.shape == (B, 2 * L) and z.shape == (B, S, L) and recon.shape == (B, S, D)
    assert jnp.allclose(latent, latent_r, atol=1e-4, rtol=1e-4)
    assert jnp.allclose(z, z_r, atol=1e-4, rtol=1e-4)
    assert jnp.allclose(recon, recon_r, atol=1e-4, rtol=1e-4)

    # Default path: bf16 MXU operands (f32 accumulation) -> looser tolerance.
    latent_b, z_b, recon_b = pvae_forward(x, mask, eps, params)
    jax.block_until_ready((latent_b, z_b, recon_b))
    assert latent_b.shape == (B, 2 * L) and z_b.shape == (B, S, L) and recon_b.shape == (B, S, D)
    assert jnp.allclose(latent_b, latent_r, atol=5e-2, rtol=5e-2)
    assert jnp.allclose(z_b, z_r, atol=5e-2, rtol=5e-2)
    assert jnp.allclose(recon_b, recon_r, atol=5e-2, rtol=5e-2)

    # TODO(synk): PVAE.loss/fit/impute/generate (training loop, KL, torch Distributions)
    # are host-side / autograd logic and are out of scope for the forward kernel.
    print("KERNEL_OK")
</pallas_src>

<mosaic_0001>
module attributes {stable_mosaic.version = 11 : i64} {
  func.func @_pvae_fused_kernel(%arg0: i32, %arg1: memref<2x16xf32, #tpu.memory_space<vmem>>, %arg2: memref<2x16xf32, #tpu.memory_space<vmem>>, %arg3: memref<2x128x8xf32, #tpu.memory_space<vmem>>, %arg4: memref<16x32xf32, #tpu.memory_space<vmem>>, %arg5: memref<16x32xf32, #tpu.memory_space<vmem>>, %arg6: memref<1x32xf32, #tpu.memory_space<vmem>>, %arg7: memref<32x16xf32, #tpu.memory_space<vmem>>, %arg8: memref<1x16xf32, #tpu.memory_space<vmem>>, %arg9: memref<8x32xf32, #tpu.memory_space<vmem>>, %arg10: memref<1x32xf32, #tpu.memory_space<vmem>>, %arg11: memref<32x16xf32, #tpu.memory_space<vmem>>, %arg12: memref<1x16xf32, #tpu.memory_space<vmem>>, %arg13: memref<2x16xf32, #tpu.memory_space<vmem>>, %arg14: memref<256x8xf32, #tpu.memory_space<vmem>>, %arg15: memref<256x16xf32, #tpu.memory_space<vmem>>) attributes {dimension_semantics = [#tpu.dimension_semantics<parallel>], iteration_bounds = array<i64: 1>, scalar_prefetch = 0 : i64, scratch_operands = 0 : i64, tpu.core_type = #tpu.core_type<tc>, window_params = [{transform_indices = @transform_0, window_bounds = array<i64: 2, 16>}, {transform_indices = @transform_1, window_bounds = array<i64: 2, 16>}, {transform_indices = @transform_2, window_bounds = array<i64: 2, 128, 8>}, {pipeline_mode = #tpu.pipeline_mode<synchronous>, transform_indices = @transform_3, window_bounds = array<i64: 16, 32>}, {pipeline_mode = #tpu.pipeline_mode<synchronous>, transform_indices = @transform_4, window_bounds = array<i64: 16, 32>}, {pipeline_mode = #tpu.pipeline_mode<synchronous>, transform_indices = @transform_5, window_bounds = array<i64: 1, 32>}, {pipeline_mode = #tpu.pipeline_mode<synchronous>, transform_indices = @transform_6, window_bounds = array<i64: 32, 16>}, {pipeline_mode = #tpu.pipeline_mode<synchronous>, transform_indices = @transform_7, window_bounds = array<i64: 1, 16>}, {pipeline_mode = #tpu.pipeline_mode<synchronous>, transform_indices = @transform_8, window_bounds = array<i64: 8, 32>}, {pipeline_mode = #tpu.pipeline_mode<synchronous>, transform_indices = @transform_9, window_bounds = array<i64: 1, 32>}, {pipeline_mode = #tpu.pipeline_mode<synchronous>, transform_indices = @transform_10, window_bounds = array<i64: 32, 16>}, {pipeline_mode = #tpu.pipeline_mode<synchronous>, transform_indices = @transform_11, window_bounds = array<i64: 1, 16>}, {transform_indices = @transform_12, window_bounds = array<i64: 2, 16>}, {transform_indices = @transform_13, window_bounds = array<i64: 256, 8>}, {transform_indices = @transform_14, window_bounds = array<i64: 256, 16>}]} {
    %c0 = arith.constant 0 : index
    %c0_0 = arith.constant 0 : index
    %0 = vector.load %arg1[%c0, %c0_0] : memref<2x16xf32, #tpu.memory_space<vmem>>, vector<2x16xf32>
    %c0_1 = arith.constant 0 : index
    %c0_2 = arith.constant 0 : index
    %1 = vector.load %arg2[%c0_1, %c0_2] : memref<2x16xf32, #tpu.memory_space<vmem>>, vector<2x16xf32>
    %2 = arith.mulf %0, %1 : vector<2x16xf32>
    %c0_3 = arith.constant 0 : index
    %c0_4 = arith.constant 0 : index
    %3 = vector.load %arg4[%c0_3, %c0_4] : memref<16x32xf32, #tpu.memory_space<vmem>>, vector<16x32xf32>
    %cst = arith.constant dense<0.000000e+00> : vector<2x32xf32>
    %4 = tpu.matmul %2, %3, %cst {dimension_numbers = #tpu.dot_dimension_numbers<[1], [0], [0], [1], [0, 0, 1, 1], [], []>} : vector<2x16xf32>, vector<16x32xf32>, vector<2x32xf32> -> vector<2x32xf32>
    %c0_5 = arith.constant 0 : index
    %c0_6 = arith.constant 0 : index
    %5 = vector.load %arg5[%c0_5, %c0_6] : memref<16x32xf32, #tpu.memory_space<vmem>>, vector<16x32xf32>
    %cst_7 = arith.constant dense<0.000000e+00> : vector<2x32xf32>
    %6 = tpu.matmul %1, %5, %cst_7 {dimension_numbers = #tpu.dot_dimension_numbers<[1], [0], [0], [1], [0, 0, 1, 1], [], []>} : vector<2x16xf32>, vector<16x32xf32>, vector<2x32xf32> -> vector<2x32xf32>
    %7 = arith.addf %4, %6 : vector<2x32xf32>
    %c0_8 = arith.constant 0 : index
    %c0_9 = arith.constant 0 : index
    %8 = vector.load %arg6[%c0_8, %c0_9] : memref<1x32xf32, #tpu.memory_space<vmem>>, vector<1x32xf32>
    %9 = vector.broadcast %8 : vector<1x32xf32> to vector<2x32xf32>
    %10 = arith.addf %7, %9 : vector<2x32xf32>
    %cst_10 = arith.constant 0.000000e+00 : f32
    %11 = vector.broadcast %cst_10 : f32 to vector<2x32xf32>
    %12 = arith.maximumf %10, %11 : vector<2x32xf32>
    %c0_11 = arith.constant 0 : index
    %c0_12 = arith.constant 0 : index
    %13 = vector.load %arg7[%c0_11, %c0_12] : memref<32x16xf32, #tpu.memory_space<vmem>>, vector<32x16xf32>
    %cst_13 = arith.constant dense<0.000000e+00> : vector<2x16xf32>
    %14 = tpu.matmul %12, %13, %cst_13 {dimension_numbers = #tpu.dot_dimension_numbers<[1], [0], [0], [1], [0, 0, 1, 1], [], []>} : vector<2x32xf32>, vector<32x16xf32>, vector<2x16xf32> -> vector<2x16xf32>
    %c0_14 = arith.constant 0 : index
    %c0_15 = arith.constant 0 : index
    %15 = vector.load %arg8[%c0_14, %c0_15] : memref<1x16xf32, #tpu.memory_space<vmem>>, vector<1x16xf32>
    %16 = vector.broadcast %15 : vector<1x16xf32> to vector<2x16xf32>
    %17 = arith.addf %14, %16 : vector<2x16xf32>
    %c0_16 = arith.constant 0 : index
    %c0_17 = arith.constant 0 : index
    %18 = vector.load %arg13[%c0_16, %c0_17] : memref<2x16xf32, #tpu.memory_space<vmem>>, vector<2x16xf32>
    tpu.vector_store %arg13[%c0_16, %c0_17], %17 {strides = array<i32>} : memref<2x16xf32, #tpu.memory_space<vmem>>, vector<2x16xf32>,
    %19 = vector.extract_strided_slice %17 {offsets = [0, 0], sizes = [2, 8], strides = [1, 1]} : vector<2x16xf32> to vector<2x8xf32>
    %20 = vector.extract_strided_slice %17 {offsets = [0, 8], sizes = [2, 8], strides = [1, 1]} : vector<2x16xf32> to vector<2x8xf32>
    %21 = math.exp %20 : vector<2x8xf32>
    %22 = vector.shape_cast %19 : vector<2x8xf32> to vector<2x1x8xf32>
    %c0_18 = arith.constant 0 : index
    %c0_19 = arith.constant 0 : index
    %c0_20 = arith.constant 0 : index
    %23 = vector.load %arg3[%c0_18, %c0_19, %c0_20] : memref<2x128x8xf32, #tpu.memory_space<vmem>>, vector<2x128x8xf32>
    %24 = vector.shape_cast %21 : vector<2x8xf32> to vector<2x1x8xf32>
    %25 = vector.broadcast %24 : vector<2x1x8xf32> to vector<2x128x8xf32>
    %26 = arith.mulf %23, %25 : vector<2x128x8xf32>
    %27 = vector.broadcast %22 : vector<2x1x8xf32> to vector<2x128x8xf32>
    %28 = arith.addf %27, %26 : vector<2x128x8xf32>
    %29 = vector.shape_cast %28 : vector<2x128x8xf32> to vector<256x8xf32>
    %c0_21 = arith.constant 0 : index
    %c0_22 = arith.constant 0 : index
    %30 = vector.load %arg14[%c0_21, %c0_22] : memref<256x8xf32, #tpu.memory_space<vmem>>, vector<256x8xf32>
    tpu.vector_store %arg14[%c0_21, %c0_22], %29 {strides = array<i32>} : memref<256x8xf32, #tpu.memory_space<vmem>>, vector<256x8xf32>,
    %c0_23 = arith.constant 0 : index
    %c0_24 = arith.constant 0 : index
    %31 = vector.load %arg9[%c0_23, %c0_24] : memref<8x32xf32, #tpu.memory_space<vmem>>, vector<8x32xf32>
    %cst_25 = arith.constant dense<0.000000e+00> : vector<256x32xf32>
    %32 = tpu.matmul %29, %31, %cst_25 {dimension_numbers = #tpu.dot_dimension_numbers<[1], [0], [0], [1], [0, 0, 1, 1], [], []>} : vector<256x8xf32>, vector<8x32xf32>, vector<256x32xf32> -> vector<256x32xf32>
    %c0_26 = arith.constant 0 : index
    %c0_27 = arith.constant 0 : index
    %33 = vector.load %arg10[%c0_26, %c0_27] : memref<1x32xf32, #tpu.memory_space<vmem>>, vector<1x32xf32>
    %34 = vector.broadcast %33 : vector<1x32xf32> to vector<256x32xf32>
    %35 = arith.addf %32, %34 : vector<256x32xf32>
    %cst_28 = arith.constant 0.000000e+00 : f32
    %36 = vector.broadcast %cst_28 : f32 to vector<256x32xf32>
    %37 = arith.maximumf %35, %36 : vector<256x32xf32>
    %c0_29 = arith.constant 0 : index
    %c0_30 = arith.constant 0 : index
    %38 = vector.load %arg11[%c0_29, %c0_30] : memref<32x16xf32, #tpu.memory_space<vmem>>, vector<32x16xf32>
    %cst_31 = arith.constant dense<0.000000e+00> : vector<256x16xf32>
    %39 = tpu.matmul %37, %38, %cst_31 {dimension_numbers = #tpu.dot_dimension_numbers<[1], [0], [0], [1], [0, 0, 1, 1], [], []>} : vector<256x32xf32>, vector<32x16xf32>, vector<256x16xf32> -> vector<256x16xf32>
    %c0_32 = arith.constant 0 : index
    %c0_33 = arith.constant 0 : index
    %40 = vector.load %arg12[%c0_32, %c0_33] : memref<1x16xf32, #tpu.memory_space<vmem>>, vector<1x16xf32>
    %41 = vector.broadcast %40 : vector<1x16xf32> to vector<256x16xf32>
    %42 = arith.addf %39, %41 : vector<256x16xf32>
    %c0_34 = arith.constant 0 : index
    %c0_35 = arith.constant 0 : index
    %43 = vector.load %arg15[%c0_34, %c0_35] : memref<256x16xf32, #tpu.memory_space<vmem>>, vector<256x16xf32>
    tpu.vector_store %arg15[%c0_34, %c0_35], %42 {strides = array<i32>} : memref<256x16xf32, #tpu.memory_space<vmem>>, vector<256x16xf32>,
    return
  }
  func.func @transform_0(%arg0: i32) -> (i32, i32) {
    %c0_i32 = arith.constant 0 : i32
    %c0_i32_0 = arith.constant 0 : i32
    return %arg0, %c0_i32 : i32, i32
  }
  func.func @transform_1(%arg0: i32) -> (i32, i32) {
    %c0_i32 = arith.constant 0 : i32
    %c0_i32_0 = arith.constant 0 : i32
    return %arg0, %c0_i32 : i32, i32
  }
  func.func @transform_2(%arg0: i32) -> (i32, i32, i32) {
    %c0_i32 = arith.constant 0 : i32
    %c0_i32_0 = arith.constant 0 : i32
    %c0_i32_1 = arith.constant 0 : i32
    return %arg0, %c0_i32, %c0_i32_0 : i32, i32, i32
  }
  func.func @transform_3(%arg0: i32) -> (i32, i32) {
    %c0_i32 = arith.constant 0 : i32
    %c0_i32_0 = arith.constant 0 : i32
    %c0_i32_1 = arith.constant 0 : i32
    return %c0_i32, %c0_i32_0 : i32, i32
  }
  func.func @transform_4(%arg0: i32) -> (i32, i32) {
    %c0_i32 = arith.constant 0 : i32
    %c0_i32_0 = arith.constant 0 : i32
    %c0_i32_1 = arith.constant 0 : i32
    return %c0_i32, %c0_i32_0 : i32, i32
  }
  func.func @transform_5(%arg0: i32) -> (i32, i32) {
    %c0_i32 = arith.constant 0 : i32
    %c0_i32_0 = arith.constant 0 : i32
    %c0_i32_1 = arith.constant 0 : i32
    return %c0_i32, %c0_i32_0 : i32, i32
  }
  func.func @transform_6(%arg0: i32) -> (i32, i32) {
    %c0_i32 = arith.constant 0 : i32
    %c0_i32_0 = arith.constant 0 : i32
    %c0_i32_1 = arith.constant 0 : i32
    return %c0_i32, %c0_i32_0 : i32, i32
  }
  func.func @transform_7(%arg0: i32) -> (i32, i32) {
    %c0_i32 = arith.constant 0 : i32
    %c0_i32_0 = arith.constant 0 : i32
    %c0_i32_1 = arith.constant 0 : i32
    return %c0_i32, %c0_i32_0 : i32, i32
  }
  func.func @transform_8(%arg0: i32) -> (i32, i32) {
    %c0_i32 = arith.constant 0 : i32
    %c0_i32_0 = arith.constant 0 : i32
    %c0_i32_1 = arith.constant 0 : i32
    return %c0_i32, %c0_i32_0 : i32, i32
  }
  func.func @transform_9(%arg0: i32) -> (i32, i32) {
    %c0_i32 = arith.constant 0 : i32
    %c0_i32_0 = arith.constant 0 : i32
    %c0_i32_1 = arith.constant 0 : i32
    return %c0_i32, %c0_i32_0 : i32, i32
  }
  func.func @transform_10(%arg0: i32) -> (i32, i32) {
    %c0_i32 = arith.constant 0 : i32
    %c0_i32_0 = arith.constant 0 : i32
    %c0_i32_1 = arith.constant 0 : i32
    return %c0_i32, %c0_i32_0 : i32, i32
  }
  func.func @transform_11(%arg0: i32) -> (i32, i32) {
    %c0_i32 = arith.constant 0 : i32
    %c0_i32_0 = arith.constant 0 : i32
    %c0_i32_1 = arith.constant 0 : i32
    return %c0_i32, %c0_i32_0 : i32, i32
  }
  func.func @transform_12(%arg0: i32) -> (i32, i32) {
    %c0_i32 = arith.constant 0 : i32
    %c0_i32_0 = arith.constant 0 : i32
    return %arg0, %c0_i32 : i32, i32
  }
  func.func @transform_13(%arg0: i32) -> (i32, i32) {
    %c0_i32 = arith.constant 0 : i32
    %c0_i32_0 = arith.constant 0 : i32
    return %arg0, %c0_i32 : i32, i32
  }
  func.func @transform_14(%arg0: i32) -> (i32, i32) {
    %c0_i32 = arith.constant 0 : i32
    %c0_i32_0 = arith.constant 0 : i32
    return %arg0, %c0_i32 : i32, i32
  }
}

</mosaic_0001>

<bundles_post_ra>
// kernel: tpu_custom_call.1
= control target key start
LH: loop header
LB: loop body
LE: loop exit
PB: predicated region body
PF: predicated region fallthrough
CT: control target
= control target key end

     0   :  { %vm52_vm0 = vcmask 130048   ;;  %s1662_s0 = inlined_call_operand.vmem [shape: f32[2,16], index: 0, kind: input, shape index: {}]   ;;  %s1663_s1 = inlined_call_operand.vmem [shape: f32[2,16], index: 1, kind: input, shape index: {}]   ;;  %s1664_s2 = inlined_call_operand.vmem [shape: f32[2,128,8], index: 2, kind: input, shape index: {}]   ;;  %s1665_s3 = inlined_call_operand.vmem [shape: f32[16,32], index: 3, kind: input, shape index: {}]   ;;  %s1666_s4 = inlined_call_operand.vmem [shape: f32[16,32], index: 4, kind: input, shape index: {}]   ;;  %s1667_s5 = inlined_call_operand.vmem [shape: f32[1,32], index: 5, kind: input, shape index: {}]   ;;  %s1668_s6 = inlined_call_operand.vmem [shape: f32[32,16], index: 6, kind: input, shape index: {}]   ;;  %s1669_s7 = inlined_call_operand.vmem [shape: f32[1,16], index: 7, kind: input, shape index: {}]   ;;  %s1670_s8 = inlined_call_operand.vmem [shape: f32[8,32], index: 8, kind: input, shape index: {}]   ;;  %s1671_s9 = inlined_call_operand.vmem [shape: f32[1,32], index: 9, kind: input, shape index: {}]   ;;  %s1672_s10 = inlined_call_operand.vmem [shape: f32[32,16], index: 10, kind: input, shape index: {}]   ;;  %s1673_s11 = inlined_call_operand.vmem [shape: f32[1,16], index: 11, kind: input, shape index: {}]   ;;  %s1674_s12 = inlined_call_operand.hbm [shape: f32[2,16], index: 12, kind: output, shape index: {0}]   ;;  %s1675_s13 = inlined_call_operand.vmem [shape: f32[256,8], index: 13, kind: output, shape index: {1}]   ;;  %s1676_s14 = inlined_call_operand.vmem [shape: f32[256,16], index: 14, kind: output, shape index: {2}]  }
   0x1   :  { %v51_v0 = vld [vmem:[%s1666_s4 + $0x8] sm:$0xff]  ;;  %v50_v2 = vld [vmem:[%s1666_s4] sm:$0xff] }
   0x2   :  { %v49_v1 = vld [vmem:[%s1665_s3 + $0x8] sm:$0xff]  ;;  %70 = vmatpush.msra.mxu0 %v51_v0  ;;  %v48_v3 = vld [vmem:[%s1665_s3] sm:$0xff] }
   0x3   :  { %93 = vmatpush.msra.mxu1 %v49_v1  ;;  %v45_v4 = vld [vmem:[%s1662_s0] sm:$0x3] }
   0x4   :  { %v46_v5 = vld [vmem:[%s1663_s1] sm:$0x3]  ;;  %71 = vmatpush.msra.mxu0 %v50_v2 }
   0x5   :  { %v47_v6 = vmul.f32 %v46_v5, %v45_v4  ;;  %94 = vmatpush.msra.mxu1 %v48_v3 }
   0x6   :  { %20 = vsyncpa [#allocation3], 0  ;;  %805 = vmatmul.msk.f32.vlgmr.msra.gmra.mxu0 %vm52_vm0, %v46_v5  ;;  %v108_v7 = vld [vmem:[%s1668_s6 + $0x18] sm:$0xff]  ;;  %v107_v8 = vld [vmem:[%s1668_s6 + $0x10] sm:$0xff]  ;;  %vm113_vm1 = vcmask 261120   ;;  %vm137_vm2 = vcmask 123904  }
   0x7   :  { %806 = vmatmul.msk.f32.vlgmr.msra.gmra.mxu1 %vm52_vm0, %v47_v6  ;;  %129 = vmatpush.msra.mxu2 %v108_v7  ;;  %v106_v9 = vld [vmem:[%s1668_s6 + $0x8] sm:$0xff]  ;;  %v105_v10 = vld [vmem:[%s1668_s6] sm:$0xff]  ;;  %v158_v27 = vld [vmem:[%s1664_s2 + $0x78] sm:$0xff]  ;;  %vm253_vm3 = vcmask 64512   ;;  %s788_s15 = sshll.u32 %s1674_s12, 4  ;;  %s789_s15 = int_to_ptr.hbm [resolvable:$true] %s788_s15 }
   0x8   :  { %v879_v11 = vld [vmem:[%s1667_s5] ss:$0 sm:$0xff]  ;;  %s911_s5 = smov 120   ;;  %v144_v28 = vld [vmem:[%s1664_s2 + $0x8] sm:$0xff]  ;;  %v145_v29 = vld [vmem:[%s1664_s2 + $0x10] sm:$0xff] }
   0x9   :  { %130 = vmatpush.msra.mxu2 %v107_v8  ;;  %v880_v17 = vld [vmem:[%s1669_s7] ss:$0 sm:$0xff]  ;;  %v146_v30 = vld [vmem:[%s1664_s2 + $0x18] sm:$0xff]  ;;  %v148_v34 = vld [vmem:[%s1664_s2 + $0x28] sm:$0xff] }
   0xa   :  { %v286_v25 = vld [vmem:[%s1670_s8] sm:$0xff]  ;;  %v149_v39 = vld [vmem:[%s1664_s2 + $0x30] sm:$0xff]  ;;  %v160_v51 = vld [vmem:[%s1664_s2 + $0x88] sm:$0xff] }
   0xb   :  { %131 = vmatpush.msra.mxu2 %v106_v9  ;;  %872 = vmatpush.msra.mxu3 %v286_v25  ;;  %v143_v26 = vld [vmem:[%s1664_s2] sm:$0xff]  ;;  %v161_v52 = vld [vmem:[%s1664_s2 + $0x90] sm:$0xff]  ;;  %v162_v54 = vld [vmem:[%s1664_s2 + $0x98] sm:$0xff] }
   0xc   :  { %v147_v31 = vld [vmem:[%s1664_s2 + $0x20] sm:$0xff]  ;;  %v164_v57 = vld [vmem:[%s1664_s2 + $0xa8] sm:$0xff]  ;;  %v150_v61 = vld [vmem:[%s1664_s2 + $0x38] sm:$0xff] }
   0xd   :  { %132 = vmatpush.msra.mxu2 %v105_v10  ;;  %v159_v49 = vld [vmem:[%s1664_s2 + $0x80] sm:$0xff]  ;;  %v165_v2 = vld [vmem:[%s1664_s2 + $0xb0] sm:$0xff]  ;;  %v166_v10 = vld [vmem:[%s1664_s2 + $0xb8] sm:$0xff] }
   0xe   :  { %v163_v56 = vld [vmem:[%s1664_s2 + $0xa0] sm:$0xff] }
   0xf   :  { %402 = vmatpush.msrb.mxu2 %v286_v25  ;;  %v151_v5 = vld [vmem:[%s1664_s2 + $0x40] sm:$0xff]  ;;  %v154_v25 = vld [vmem:[%s1664_s2 + $0x58] sm:$0xff] }
  0x83   :  { %v73_v12 = vpop.f32.mrf.mxu0 }
  0x84   :  { %v96_v13 = vpop.f32.mrf.mxu1 }
  0x85   :  { %v97_v14 = vadd.f32 %v96_v13, %v73_v12  ;;  %v152_v13 = vld [vmem:[%s1664_s2 + $0x48] sm:$0xff] }
  0x87   :  { %v103_v15 = vadd.f32 %v879_v11, %v97_v14 }
  0x89   :  { %v104_v16 = vmax.f32 %v103_v15, 0.0 }
  0x8b   :  { %807 = vmatmul.msk.f32.vlgmr.msra.gmra.mxu2 %vm113_vm1, %v104_v16  ;;  %v167_v16 = vld [vmem:[%s1664_s2 + $0xc0] sm:$0xff] }
 0x10e   :  { %v134_v18 = vpop.f32.mrf.mxu2 }
 0x10f   :  { %v135_v19 = vadd.f32 %v880_v17, %v134_v18 }
 0x111   :  { %v139_v20 = vmul.f32 1.442695, %v135_v19  ;;  %138 = vst.msk [vmem:[#allocation2] sm:$0x3] %vm137_vm2, %v135_v19  ;;  %v1048_v32 = vperm.slane %v135_v19, 0  ;;  %v142_v46 = vrot.slane %v135_v19, 1 }
 0x112   :  { %v153_v19 = vld [vmem:[%s1664_s2 + $0x50] sm:$0xff] }
 0x113   :  { %883 = vpow2.f32 %v139_v20  ;;  %v1113_v58 = vperm.slane %v142_v46, 0 }
 0x119   :  { %v884_v21 = vpop.eup %883 }
 0x11a   :  { %v177_v22 = vperm.slane %v884_v21, 0  ;;  %v176_v23 = vrot.slane %v884_v21, 1 }
 0x11c   :  { %179 = vrot.lane.b32.xlu0 %v177_v22, %s911_s5  ;;  %v178_v24 = vperm.slane %v176_v23, 0  ;;  %v168_v22 = vld [vmem:[%s1664_s2 + $0xc8] sm:$0xff] }
 0x124   :  { %181 = vrot.lane.b32.xlu0 %v178_v24, %s911_s5 }
 0x18e   :  { %v1050_v33 = vpop.permute.xlu0 %179 }
 0x18f   :  { %v185_v35 = vmul.f32 %v1050_v33, %v143_v26  ;;  %v200_v36 = vmul.f32 %v1050_v33, %v158_v27  ;;  %v186_v37 = vmul.f32 %v1050_v33, %v144_v28  ;;  %v187_v38 = vmul.f32 %v1050_v33, %v145_v29  ;;  %v169_v28 = vld [vmem:[%s1664_s2 + $0xd0] sm:$0xff] }
 0x190   :  { %v188_v40 = vmul.f32 %v1050_v33, %v146_v30  ;;  %v189_v41 = vmul.f32 %v1050_v33, %v147_v31  ;;  %v190_v45 = vmul.f32 %v1050_v33, %v148_v34  ;;  %v191_v48 = vmul.f32 %v1050_v33, %v149_v39  ;;  %v155_v31 = vld [vmem:[%s1664_s2 + $0x60] sm:$0xff]  ;;  %v156_v39 = vld [vmem:[%s1664_s2 + $0x68] sm:$0xff] }
 0x191   :  { %v221_v42 = vadd.f32 %v1048_v32, %v185_v35  ;;  %v236_v43 = vadd.f32 %v1048_v32, %v200_v36  ;;  %v222_v44 = vadd.f32 %v1048_v32, %v186_v37  ;;  %v1069_v47 = vadd.f32 %v1048_v32, %v187_v38  ;;  %v170_v36 = vld [vmem:[%s1664_s2 + $0xd8] sm:$0xff] }
 0x192   :  { %v1082_v50 = vadd.f32 %v1048_v32, %v188_v40  ;;  %v1095_v53 = vadd.f32 %v1048_v32, %v189_v41  ;;  %v1105_v55 = vadd.f32 %v1048_v32, %v190_v45  ;;  %v1123_v60 = vadd.f32 %v1048_v32, %v191_v48  ;;  %v157_v45 = vld [vmem:[%s1664_s2 + $0x70] sm:$0xff]  ;;  %v172_v48 = vld [vmem:[%s1664_s2 + $0xe8] sm:$0xff] }
 0x193   :  { %254 = vst.msk [vmem:[%s1675_s13] sm:$0xff] %vm253_vm3, %v221_v42  ;;  %808 = vmatmul.msk.f32.vlgmr.msrb.gmra.mxu2 %vm253_vm3, %v221_v42  ;;  %823 = vmatmul.msk.f32.vlgmr.msra.gmra.mxu3 %vm253_vm3, %v236_v43  ;;  %v192_v9 = vmul.f32 %v1050_v33, %v150_v61  ;;  %v193_v15 = vmul.f32 %v1050_v33, %v151_v5  ;;  %v171_v42 = vld [vmem:[%s1664_s2 + $0xe0] sm:$0xff] }
 0x194   :  { %269 = vst.msk [vmem:[%s1675_s13 + $0x78] sm:$0xff] %vm253_vm3, %v236_v43  ;;  %v194_v21 = vmul.f32 %v1050_v33, %v152_v13  ;;  %v195_v27 = vmul.f32 %v1050_v33, %v153_v19  ;;  %v196_v35 = vmul.f32 %v1050_v33, %v154_v25  ;;  %v197_v41 = vmul.f32 %v1050_v33, %v155_v31 }
 0x195   :  { %255 = vst.msk [vmem:[%s1675_s13 + $0x8] sm:$0xff] %vm253_vm3, %v222_v44  ;;  %v1206_v20 = vadd.f32 %v1048_v32, %v192_v9  ;;  %v1230_v26 = vadd.f32 %v1048_v32, %v193_v15 }
 0x196   :  { %v1115_v59 = vpop.permute.xlu0 %181  ;;  %256 = vst.msk [vmem:[%s1675_s13 + $0x10] sm:$0xff] %vm253_vm3, %v1069_v47  ;;  %v230_v34 = vadd.f32 %v1048_v32, %v194_v21  ;;  %v231_v40 = vadd.f32 %v1048_v32, %v195_v27  ;;  %v232_v46 = vadd.f32 %v1048_v32, %v196_v35 }
 0x197   :  { %v201_v62 = vmul.f32 %v1115_v59, %v159_v49  ;;  %v202_v63 = vmul.f32 %v1115_v59, %v160_v51  ;;  %257 = vst.msk [vmem:[%s1675_s13 + $0x18] sm:$0xff] %vm253_vm3, %v1082_v50  ;;  %v203_v0 = vmul.f32 %v1115_v59, %v161_v52  ;;  %v204_v1 = vmul.f32 %v1115_v59, %v162_v54  ;;  %v173_v52 = vld [vmem:[%s1664_s2 + $0xf0] sm:$0xff] }
 0x198   :  { %258 = vst.msk [vmem:[%s1675_s13 + $0x20] sm:$0xff] %vm253_vm3, %v1095_v53  ;;  %v205_v3 = vmul.f32 %v1115_v59, %v163_v56  ;;  %v206_v4 = vmul.f32 %v1115_v59, %v164_v57  ;;  %v207_v12 = vmul.f32 %v1115_v59, %v165_v2  ;;  %v208_v18 = vmul.f32 %v1115_v59, %v166_v10  ;;  %v174_v57 = vld [vmem:[%s1664_s2 + $0xf8] sm:$0xff] }
 0x199   :  { %v237_v6 = vadd.f32 %v1113_v58, %v201_v62  ;;  %v238_v7 = vadd.f32 %v1113_v58, %v202_v63  ;;  %v1153_v8 = vadd.f32 %v1113_v58, %v203_v0  ;;  %259 = vst.msk [vmem:[%s1675_s13 + $0x28] sm:$0xff] %vm253_vm3, %v1105_v55  ;;  %v1165_v11 = vadd.f32 %v1113_v58, %v204_v1 }
 0x19a   :  { %260 = vst.msk [vmem:[%s1675_s13 + $0x30] sm:$0xff] %vm253_vm3, %v1123_v60  ;;  %v1183_v14 = vadd.f32 %v1113_v58, %v205_v3  ;;  %v1194_v17 = vadd.f32 %v1113_v58, %v206_v4  ;;  %v1218_v23 = vadd.f32 %v1113_v58, %v207_v12  ;;  %v209_v24 = vmul.f32 %v1115_v59, %v167_v16  ;;  %v1425_v3 = vld [vmem:[%s1671_s9] ss:$0 sm:$0xff] }
 0x19b   :  { %809 = vmatmul.msk.f32.gmra.mxu2 %vm253_vm3, %v222_v44  ;;  %270 = vst.msk [vmem:[%s1675_s13 + $0x80] sm:$0xff] %vm253_vm3, %v237_v6  ;;  %824 = vmatmul.msk.f32.gmra.mxu3 %vm253_vm3, %v237_v6  ;;  %v1242_v29 = vadd.f32 %v1113_v58, %v208_v18  ;;  %v210_v30 = vmul.f32 %v1115_v59, %v168_v22 }
 0x19c   :  { %271 = vst.msk [vmem:[%s1675_s13 + $0x88] sm:$0xff] %vm253_vm3, %v238_v7  ;;  %v245_v37 = vadd.f32 %v1113_v58, %v209_v24  ;;  %v211_v38 = vmul.f32 %v1115_v59, %v169_v28  ;;  %v212_v44 = vmul.f32 %v1115_v59, %v170_v36  ;;  %v213_v51 = vmul.f32 %v1115_v59, %v171_v42 }
 0x19d   :  { %272 = vst.msk [vmem:[%s1675_s13 + $0x90] sm:$0xff] %vm253_vm3, %v1153_v8  ;;  %v246_v43 = vadd.f32 %v1113_v58, %v210_v30  ;;  %v233_v54 = vadd.f32 %v1048_v32, %v197_v41  ;;  %v199_v56 = vmul.f32 %v1050_v33, %v157_v45  ;;  %v214_v62 = vmul.f32 %v1115_v59, %v172_v48 }
 0x19e   :  { %273 = vst.msk [vmem:[%s1675_s13 + $0x98] sm:$0xff] %vm253_vm3, %v1165_v11  ;;  %v247_v49 = vadd.f32 %v1113_v58, %v211_v38  ;;  %v248_v61 = vadd.f32 %v1113_v58, %v212_v44  ;;  %v215_v63 = vmul.f32 %v1115_v59, %v173_v52  ;;  %v249_v0 = vadd.f32 %v1113_v58, %v213_v51 }
 0x19f   :  { %274 = vst.msk [vmem:[%s1675_s13 + $0xa0] sm:$0xff] %vm253_vm3, %v1183_v14  ;;  %v216_v1 = vmul.f32 %v1115_v59, %v174_v57  ;;  %v235_v2 = vadd.f32 %v1048_v32, %v199_v56  ;;  %v250_v59 = vadd.f32 %v1113_v58, %v214_v62 }
 0x1a0   :  { %275 = vst.msk [vmem:[%s1675_s13 + $0xa8] sm:$0xff] %vm253_vm3, %v1194_v17 }
 0x1a1   :  { %261 = vst.msk [vmem:[%s1675_s13 + $0x38] sm:$0xff] %vm253_vm3, %v1206_v20 }
 0x1a2   :  { %276 = vst.msk [vmem:[%s1675_s13 + $0xb0] sm:$0xff] %vm253_vm3, %v1218_v23 }
 0x1a3   :  { %810 = vmatmul.msk.f32.gmra.mxu2 %vm253_vm3, %v1069_v47  ;;  %825 = vmatmul.msk.f32.gmra.mxu3 %vm253_vm3, %v238_v7  ;;  %262 = vst.msk [vmem:[%s1675_s13 + $0x40] sm:$0xff] %vm253_vm3, %v1230_v26  ;;  %v198_v47 = vmul.f32 %v1050_v33, %v156_v39 }
 0x1a4   :  { %277 = vst.msk [vmem:[%s1675_s13 + $0xb8] sm:$0xff] %vm253_vm3, %v1242_v29 }
 0x1a5   :  { %263 = vst.msk [vmem:[%s1675_s13 + $0x48] sm:$0xff] %vm253_vm3, %v230_v34  ;;  %v234_v33 = vadd.f32 %v1048_v32, %v198_v47  ;;  %v252_v32 = vadd.f32 %v1113_v58, %v216_v1 }
 0x1a6   :  { %278 = vst.msk [vmem:[%s1675_s13 + $0xc0] sm:$0xff] %vm253_vm3, %v245_v37 }
 0x1a7   :  { %264 = vst.msk [vmem:[%s1675_s13 + $0x50] sm:$0xff] %vm253_vm3, %v231_v40 }
 0x1a8   :  { %279 = vst.msk [vmem:[%s1675_s13 + $0xc8] sm:$0xff] %vm253_vm3, %v246_v43 }
 0x1a9   :  { %265 = vst.msk [vmem:[%s1675_s13 + $0x58] sm:$0xff] %vm253_vm3, %v232_v46 }
 0x1aa   :  { %280 = vst.msk [vmem:[%s1675_s13 + $0xd0] sm:$0xff] %vm253_vm3, %v247_v49 }
 0x1ab   :  { %811 = vmatmul.msk.f32.gmra.mxu2 %vm253_vm3, %v1082_v50  ;;  %826 = vmatmul.msk.f32.gmra.mxu3 %vm253_vm3, %v1153_v8  ;;  %266 = vst.msk [vmem:[%s1675_s13 + $0x60] sm:$0xff] %vm253_vm3, %v233_v54  ;;  %v251_v50 = vadd.f32 %v1113_v58, %v215_v63  ;;  %v533_v58 = vld [vmem:[%s1672_s10 + $0x8] sm:$0xff] }
 0x1ac   :  { %281 = vst.msk [vmem:[%s1675_s13 + $0xd8] sm:$0xff] %vm253_vm3, %v248_v61 }
 0x1ad   :  { %267 = vst.msk [vmem:[%s1675_s13 + $0x68] sm:$0xff] %vm253_vm3, %v234_v33 }
 0x1ae   :  { %282 = vst.msk [vmem:[%s1675_s13 + $0xe0] sm:$0xff] %vm253_vm3, %v249_v0 }
 0x1af   :  { %268 = vst.msk [vmem:[%s1675_s13 + $0x70] sm:$0xff] %vm253_vm3, %v235_v2 }
 0x1b0   :  { %283 = vst.msk [vmem:[%s1675_s13 + $0xe8] sm:$0xff] %vm253_vm3, %v250_v59 }
 0x1b1   :  { %284 = vst.msk [vmem:[%s1675_s13 + $0xf0] sm:$0xff] %vm253_vm3, %v251_v50 }
 0x1b2   :  { %285 = vst.msk [vmem:[%s1675_s13 + $0xf8] sm:$0xff] %vm253_vm3, %v252_v32 }
 0x1b3   :  { %812 = vmatmul.msk.f32.gmra.mxu2 %vm253_vm3, %v1095_v53  ;;  %827 = vmatmul.msk.f32.gmra.mxu3 %vm253_vm3, %v1165_v11  ;;  %v535_v53 = vld [vmem:[%s1672_s10 + $0x18] sm:$0xff] }
 0x1b4   :  { %648 = vmatpush.msrb.mxu0 %v535_v53  ;;  %873 = vmatpush.msrb.mxu1 %v535_v53 }
 0x1bb   :  { %813 = vmatmul.msk.f32.gmra.mxu2 %vm253_vm3, %v1105_v55  ;;  %828 = vmatmul.msk.f32.gmra.mxu3 %vm253_vm3, %v1183_v14  ;;  %v534_v55 = vld [vmem:[%s1672_s10 + $0x10] sm:$0xff] }
 0x1bc   :  { %649 = vmatpush.msrb.mxu0 %v534_v55  ;;  %874 = vmatpush.msrb.mxu1 %v534_v55 }
 0x1be   :  { %650 = vmatpush.msrb.mxu0 %v533_v58  ;;  %875 = vmatpush.msrb.mxu1 %v533_v58 }
 0x1c3   :  { %814 = vmatmul.msk.f32.gmra.mxu2 %vm253_vm3, %v1123_v60  ;;  %829 = vmatmul.msk.f32.gmra.mxu3 %vm253_vm3, %v1194_v17  ;;  %v532_v60 = vld [vmem:[%s1672_s10] sm:$0xff] }
 0x1c4   :  { %651 = vmatpush.msrb.mxu0 %v532_v60  ;;  %876 = vmatpush.msrb.mxu1 %v532_v60 }
 0x1cb   :  { %815 = vmatmul.msk.f32.gmra.mxu2 %vm253_vm3, %v1206_v20  ;;  %830 = vmatmul.msk.f32.gmra.mxu3 %vm253_vm3, %v1218_v23 }
 0x1d3   :  { %816 = vmatmul.msk.f32.gmra.mxu2 %vm253_vm3, %v1230_v26  ;;  %831 = vmatmul.msk.f32.gmra.mxu3 %vm253_vm3, %v1242_v29 }
 0x1db   :  { %817 = vmatmul.msk.f32.gmra.mxu2 %vm253_vm3, %v230_v34  ;;  %832 = vmatmul.msk.f32.gmra.mxu3 %vm253_vm3, %v245_v37 }
 0x1e3   :  { %818 = vmatmul.msk.f32.gmra.mxu2 %vm253_vm3, %v231_v40  ;;  %833 = vmatmul.msk.f32.gmra.mxu3 %vm253_vm3, %v246_v43 }
 0x1eb   :  { %819 = vmatmul.msk.f32.gmra.mxu2 %vm253_vm3, %v232_v46  ;;  %834 = vmatmul.msk.f32.gmra.mxu3 %vm253_vm3, %v247_v49 }
 0x1f3   :  { %820 = vmatmul.msk.f32.gmra.mxu2 %vm253_vm3, %v233_v54  ;;  %835 = vmatmul.msk.f32.gmra.mxu3 %vm253_vm3, %v248_v61 }
 0x1fb   :  { %821 = vmatmul.msk.f32.gmra.mxu2 %vm253_vm3, %v234_v33  ;;  %836 = vmatmul.msk.f32.gmra.mxu3 %vm253_vm3, %v249_v0 }
 0x203   :  { %822 = vmatmul.msk.f32.gmra.mxu2 %vm253_vm3, %v235_v2  ;;  %837 = vmatmul.msk.f32.gmra.mxu3 %vm253_vm3, %v250_v59 }
 0x20b   :  { %838 = vmatmul.msk.f32.gmra.mxu3 %vm253_vm3, %v251_v50 }
 0x213   :  { %839 = vmatmul.msk.f32.gmra.mxu3 %vm253_vm3, %v252_v32 }
 0x216   :  { %v404_v4 = vpop.f32.mrf.mxu2  ;;  %v1427_v5 = vpop.f32.mrf.mxu3 }
 0x217   :  { %v405_v6 = vadd.f32 %v1425_v3, %v404_v4 }
 0x219   :  { %v500_v7 = vmax.f32 %v405_v6, 0.0 }
 0x21b   :  { %840 = vmatmul.msk.f32.vlgmr.msrb.gmra.mxu0 %vm113_vm1, %v500_v7 }
 0x21e   :  { %v407_v8 = vpop.f32.mrf.mxu2  ;;  %v452_v9 = vpop.f32.mrf.mxu3 }
 0x21f   :  { %v408_v10 = vadd.f32 %v1425_v3, %v407_v8  ;;  %v453_v11 = vadd.f32 %v1425_v3, %v452_v9 }
 0x221   :  { %v501_v12 = vmax.f32 %v408_v10, 0.0  ;;  %v516_v13 = vmax.f32 %v453_v11, 0.0 }
 0x223   :  { %841 = vmatmul.msk.f32.gmra.mxu0 %vm113_vm1, %v501_v12  ;;  %856 = vmatmul.msk.f32.vlgmr.msrb.gmra.mxu1 %vm113_vm1, %v516_v13 }
 0x226   :  { %v410_v14 = vpop.f32.mrf.mxu2  ;;  %v455_v15 = vpop.f32.mrf.mxu3 }
 0x227   :  { %v411_v16 = vadd.f32 %v1425_v3, %v410_v14  ;;  %v456_v17 = vadd.f32 %v1425_v3, %v455_v15 }
 0x229   :  { %v502_v18 = vmax.f32 %v411_v16, 0.0  ;;  %v517_v19 = vmax.f32 %v456_v17, 0.0 }
 0x22b   :  { %842 = vmatmul.msk.f32.gmra.mxu0 %vm113_vm1, %v502_v18  ;;  %857 = vmatmul.msk.f32.gmra.mxu1 %vm113_vm1, %v517_v19 }
 0x22e   :  { %v413_v20 = vpop.f32.mrf.mxu2  ;;  %v458_v21 = vpop.f32.mrf.mxu3 }
 0x22f   :  { %v414_v22 = vadd.f32 %v1425_v3, %v413_v20  ;;  %v459_v23 = vadd.f32 %v1425_v3, %v458_v21 }
 0x231   :  { %v503_v24 = vmax.f32 %v414_v22, 0.0  ;;  %v518_v25 = vmax.f32 %v459_v23, 0.0 }
 0x233   :  { %843 = vmatmul.msk.f32.gmra.mxu0 %vm113_vm1, %v503_v24  ;;  %858 = vmatmul.msk.f32.gmra.mxu1 %vm113_vm1, %v518_v25 }
 0x236   :  { %v416_v26 = vpop.f32.mrf.mxu2  ;;  %v461_v27 = vpop.f32.mrf.mxu3 }
 0x237   :  { %v417_v28 = vadd.f32 %v1425_v3, %v416_v26  ;;  %v462_v29 = vadd.f32 %v1425_v3, %v461_v27 }
 0x239   :  { %v504_v30 = vmax.f32 %v417_v28, 0.0  ;;  %v519_v31 = vmax.f32 %v462_v29, 0.0 }
 0x23b   :  { %844 = vmatmul.msk.f32.gmra.mxu0 %vm113_vm1, %v504_v30  ;;  %859 = vmatmul.msk.f32.gmra.mxu1 %vm113_vm1, %v519_v31  ;;  %v450_v30 = vadd.f32 %v1425_v3, %v1427_v5 }
 0x23e   :  { %v419_v34 = vpop.f32.mrf.mxu2  ;;  %v464_v35 = vpop.f32.mrf.mxu3 }
 0x23f   :  { %v420_v36 = vadd.f32 %v1425_v3, %v419_v34  ;;  %v465_v37 = vadd.f32 %v1425_v3, %v464_v35  ;;  %v515_v35 = vmax.f32 %v450_v30, 0.0 }
 0x241   :  { %v505_v38 = vmax.f32 %v420_v36, 0.0  ;;  %v520_v39 = vmax.f32 %v465_v37, 0.0  ;;  %v1495_v37 = vld [vmem:[%s1673_s11] ss:$0 sm:$0xff]  ;;  %s912_s11 = smov [#allocation2]  }
 0x242   :  { %s786_s16 = sshll.u32 %s912_s11, 4  ;;  %s787_s16 = int_to_ptr.vmem [resolvable:$true] %s786_s16 }
 0x243   :  { %845 = vmatmul.msk.f32.gmra.mxu0 %vm113_vm1, %v505_v38  ;;  %860 = vmatmul.msk.f32.gmra.mxu1 %vm113_vm1, %v520_v39  ;;  %791 = dma.vmem_to_hbm [thread:$0]  %s787_s16, 32, %s789_s15, [#allocation3]  }
 0x246   :  { %v422_v40 = vpop.f32.mrf.mxu2  ;;  %v467_v41 = vpop.f32.mrf.mxu3 }
 0x247   :  { %v423_v42 = vadd.f32 %v1425_v3, %v422_v40  ;;  %v468_v43 = vadd.f32 %v1425_v3, %v467_v41 }
 0x249   :  { %v506_v44 = vmax.f32 %v423_v42, 0.0  ;;  %v521_v45 = vmax.f32 %v468_v43, 0.0 }
 0x24b   :  { %846 = vmatmul.msk.f32.gmra.mxu0 %vm113_vm1, %v506_v44  ;;  %861 = vmatmul.msk.f32.gmra.mxu1 %vm113_vm1, %v521_v45 }
 0x24e   :  { %v425_v46 = vpop.f32.mrf.mxu2  ;;  %v470_v47 = vpop.f32.mrf.mxu3 }
 0x24f   :  { %v426_v48 = vadd.f32 %v1425_v3, %v425_v46  ;;  %v471_v49 = vadd.f32 %v1425_v3, %v470_v47 }
 0x251   :  { %v507_v51 = vmax.f32 %v426_v48, 0.0  ;;  %v522_v52 = vmax.f32 %v471_v49, 0.0 }
 0x253   :  { %847 = vmatmul.msk.f32.gmra.mxu0 %vm113_vm1, %v507_v51  ;;  %862 = vmatmul.msk.f32.gmra.mxu1 %vm113_vm1, %v522_v52 }
 0x256   :  { %v428_v54 = vpop.f32.mrf.mxu2  ;;  %v473_v56 = vpop.f32.mrf.mxu3 }
 0x257   :  { %v429_v57 = vadd.f32 %v1425_v3, %v428_v54  ;;  %v474_v61 = vadd.f32 %v1425_v3, %v473_v56 }
 0x259   :  { %v508_v62 = vmax.f32 %v429_v57, 0.0  ;;  %v523_v33 = vmax.f32 %v474_v61, 0.0 }
 0x25b   :  { %848 = vmatmul.msk.f32.gmra.mxu0 %vm113_vm1, %v508_v62  ;;  %863 = vmatmul.msk.f32.gmra.mxu1 %vm113_vm1, %v523_v33 }
 0x25e   :  { %v431_v63 = vpop.f32.mrf.mxu2  ;;  %v476_v0 = vpop.f32.mrf.mxu3 }
 0x25f   :  { %v432_v1 = vadd.f32 %v1425_v3, %v431_v63  ;;  %v477_v2 = vadd.f32 %v1425_v3, %v476_v0 }
 0x261   :  { %v509_v59 = vmax.f32 %v432_v1, 0.0  ;;  %v524_v50 = vmax.f32 %v477_v2, 0.0 }
 0x263   :  { %849 = vmatmul.msk.f32.gmra.mxu0 %vm113_vm1, %v509_v59  ;;  %864 = vmatmul.msk.f32.gmra.mxu1 %vm113_vm1, %v524_v50 }
 0x266   :  { %v434_v32 = vpop.f32.mrf.mxu2  ;;  %v479_v53 = vpop.f32.mrf.mxu3 }
 0x267   :  { %v435_v55 = vadd.f32 %v1425_v3, %v434_v32  ;;  %v480_v58 = vadd.f32 %v1425_v3, %v479_v53 }
 0x269   :  { %v510_v60 = vmax.f32 %v435_v55, 0.0  ;;  %v525_v4 = vmax.f32 %v480_v58, 0.0 }
 0x26b   :  { %850 = vmatmul.msk.f32.gmra.mxu0 %vm113_vm1, %v510_v60  ;;  %865 = vmatmul.msk.f32.gmra.mxu1 %vm113_vm1, %v525_v4 }
 0x26e   :  { %v437_v6 = vpop.f32.mrf.mxu2  ;;  %v482_v7 = vpop.f32.mrf.mxu3 }
 0x26f   :  { %v438_v8 = vadd.f32 %v1425_v3, %v437_v6  ;;  %v483_v9 = vadd.f32 %v1425_v3, %v482_v7 }
 0x271   :  { %v511_v10 = vmax.f32 %v438_v8, 0.0  ;;  %v526_v11 = vmax.f32 %v483_v9, 0.0 }
 0x273   :  { %851 = vmatmul.msk.f32.gmra.mxu0 %vm113_vm1, %v511_v10  ;;  %866 = vmatmul.msk.f32.gmra.mxu1 %vm113_vm1, %v526_v11 }
 0x276   :  { %v440_v12 = vpop.f32.mrf.mxu2  ;;  %v485_v13 = vpop.f32.mrf.mxu3 }
 0x277   :  { %v441_v14 = vadd.f32 %v1425_v3, %v440_v12  ;;  %v486_v15 = vadd.f32 %v1425_v3, %v485_v13 }
 0x279   :  { %v512_v16 = vmax.f32 %v441_v14, 0.0  ;;  %v527_v17 = vmax.f32 %v486_v15, 0.0 }
 0x27b   :  { %852 = vmatmul.msk.f32.gmra.mxu0 %vm113_vm1, %v512_v16  ;;  %867 = vmatmul.msk.f32.gmra.mxu1 %vm113_vm1, %v527_v17 }
 0x27e   :  { %v443_v18 = vpop.f32.mrf.mxu2  ;;  %v488_v19 = vpop.f32.mrf.mxu3 }
 0x27f   :  { %v444_v20 = vadd.f32 %v1425_v3, %v443_v18  ;;  %v489_v21 = vadd.f32 %v1425_v3, %v488_v19 }
 0x281   :  { %v513_v22 = vmax.f32 %v444_v20, 0.0  ;;  %v528_v23 = vmax.f32 %v489_v21, 0.0 }
 0x283   :  { %853 = vmatmul.msk.f32.gmra.mxu0 %vm113_vm1, %v513_v22  ;;  %868 = vmatmul.msk.f32.gmra.mxu1 %vm113_vm1, %v528_v23 }
 0x286   :  { %v446_v24 = vpop.f32.mrf.mxu2  ;;  %v491_v25 = vpop.f32.mrf.mxu3 }
 0x287   :  { %v447_v26 = vadd.f32 %v1425_v3, %v446_v24  ;;  %v492_v27 = vadd.f32 %v1425_v3, %v491_v25 }
 0x289   :  { %v514_v28 = vmax.f32 %v447_v26, 0.0  ;;  %v529_v29 = vmax.f32 %v492_v27, 0.0 }
 0x28b   :  { %854 = vmatmul.msk.f32.gmra.mxu0 %vm113_vm1, %v514_v28  ;;  %869 = vmatmul.msk.f32.gmra.mxu1 %vm113_vm1, %v529_v29 }
 0x28e   :  { %v494_v31 = vpop.f32.mrf.mxu3 }
 0x28f   :  { %v495_v34 = vadd.f32 %v1425_v3, %v494_v31 }
 0x291   :  { %v530_v36 = vmax.f32 %v495_v34, 0.0 }
 0x293   :  { %855 = vmatmul.msk.f32.gmra.mxu0 %vm113_vm1, %v515_v35  ;;  %870 = vmatmul.msk.f32.gmra.mxu1 %vm113_vm1, %v530_v36 }
 0x296   :  { %v497_v38 = vpop.f32.mrf.mxu3 }
 0x297   :  { %v498_v39 = vadd.f32 %v1425_v3, %v497_v38 }
 0x298   :  { %v653_v40 = vpop.f32.mrf.mxu0 }
 0x299   :  { %v531_v41 = vmax.f32 %v498_v39, 0.0  ;;  %v654_v5 = vadd.f32 %v1495_v37, %v653_v40 }
 0x29b   :  { %749 = vst.msk [vmem:[%s1676_s14] sm:$0xff] %vm52_vm0, %v654_v5  ;;  %871 = vmatmul.msk.f32.gmra.mxu1 %vm113_vm1, %v531_v41 }
 0x2a0   :  { %v656_v3 = vpop.f32.mrf.mxu0  ;;  %v701_v42 = vpop.f32.mrf.mxu1 }
 0x2a1   :  { %v657_v43 = vadd.f32 %v1495_v37, %v656_v3  ;;  %v702_v44 = vadd.f32 %v1495_v37, %v701_v42 }
 0x2a3   :  { %750 = vst.msk [vmem:[%s1676_s14 + $0x8] sm:$0xff] %vm52_vm0, %v657_v43 }
 0x2a4   :  { %765 = vst.msk [vmem:[%s1676_s14 + $0x80] sm:$0xff] %vm52_vm0, %v702_v44 }
 0x2a8   :  { %v659_v45 = vpop.f32.mrf.mxu0  ;;  %v704_v46 = vpop.f32.mrf.mxu1 }
 0x2a9   :  { %v660_v47 = vadd.f32 %v1495_v37, %v659_v45  ;;  %v705_v48 = vadd.f32 %v1495_v37, %v704_v46 }
 0x2ab   :  { %751 = vst.msk [vmem:[%s1676_s14 + $0x10] sm:$0xff] %vm52_vm0, %v660_v47 }
 0x2ac   :  { %766 = vst.msk [vmem:[%s1676_s14 + $0x88] sm:$0xff] %vm52_vm0, %v705_v48 }
 0x2b0   :  { %v662_v49 = vpop.f32.mrf.mxu0  ;;  %v707_v51 = vpop.f32.mrf.mxu1 }
 0x2b1   :  { %v663_v52 = vadd.f32 %v1495_v37, %v662_v49  ;;  %v708_v54 = vadd.f32 %v1495_v37, %v707_v51 }
 0x2b3   :  { %752 = vst.msk [vmem:[%s1676_s14 + $0x18] sm:$0xff] %vm52_vm0, %v663_v52 }
 0x2b4   :  { %767 = vst.msk [vmem:[%s1676_s14 + $0x90] sm:$0xff] %vm52_vm0, %v708_v54 }
 0x2b8   :  { %v665_v56 = vpop.f32.mrf.mxu0  ;;  %v710_v57 = vpop.f32.mrf.mxu1 }
 0x2b9   :  { %v666_v61 = vadd.f32 %v1495_v37, %v665_v56  ;;  %v711_v62 = vadd.f32 %v1495_v37, %v710_v57 }
 0x2bb   :  { %753 = vst.msk [vmem:[%s1676_s14 + $0x20] sm:$0xff] %vm52_vm0, %v666_v61 }
 0x2bc   :  { %768 = vst.msk [vmem:[%s1676_s14 + $0x98] sm:$0xff] %vm52_vm0, %v711_v62 }
 0x2c0   :  { %v668_v33 = vpop.f32.mrf.mxu0  ;;  %v713_v63 = vpop.f32.mrf.mxu1 }
 0x2c1   :  { %v669_v0 = vadd.f32 %v1495_v37, %v668_v33  ;;  %v714_v1 = vadd.f32 %v1495_v37, %v713_v63 }
 0x2c3   :  { %754 = vst.msk [vmem:[%s1676_s14 + $0x28] sm:$0xff] %vm52_vm0, %v669_v0 }
 0x2c4   :  { %769 = vst.msk [vmem:[%s1676_s14 + $0xa0] sm:$0xff] %vm52_vm0, %v714_v1 }
 0x2c8   :  { %v671_v2 = vpop.f32.mrf.mxu0  ;;  %v716_v59 = vpop.f32.mrf.mxu1 }
 0x2c9   :  { %v672_v50 = vadd.f32 %v1495_v37, %v671_v2  ;;  %v717_v32 = vadd.f32 %v1495_v37, %v716_v59 }
 0x2cb   :  { %755 = vst.msk [vmem:[%s1676_s14 + $0x30] sm:$0xff] %vm52_vm0, %v672_v50 }
 0x2cc   :  { %770 = vst.msk [vmem:[%s1676_s14 + $0xa8] sm:$0xff] %vm52_vm0, %v717_v32 }
 0x2d0   :  { %v674_v53 = vpop.f32.mrf.mxu0  ;;  %v719_v55 = vpop.f32.mrf.mxu1 }
 0x2d1   :  { %v675_v58 = vadd.f32 %v1495_v37, %v674_v53  ;;  %v720_v60 = vadd.f32 %v1495_v37, %v719_v55 }
 0x2d3   :  { %756 = vst.msk [vmem:[%s1676_s14 + $0x38] sm:$0xff] %vm52_vm0, %v675_v58 }
 0x2d4   :  { %771 = vst.msk [vmem:[%s1676_s14 + $0xb0] sm:$0xff] %vm52_vm0, %v720_v60 }
 0x2d8   :  { %v677_v4 = vpop.f32.mrf.mxu0  ;;  %v722_v6 = vpop.f32.mrf.mxu1 }
 0x2d9   :  { %v678_v7 = vadd.f32 %v1495_v37, %v677_v4  ;;  %v723_v8 = vadd.f32 %v1495_v37, %v722_v6 }
 0x2db   :  { %757 = vst.msk [vmem:[%s1676_s14 + $0x40] sm:$0xff] %vm52_vm0, %v678_v7 }
 0x2dc   :  { %772 = vst.msk [vmem:[%s1676_s14 + $0xb8] sm:$0xff] %vm52_vm0, %v723_v8 }
 0x2e0   :  { %v680_v9 = vpop.f32.mrf.mxu0  ;;  %v725_v10 = vpop.f32.mrf.mxu1 }
 0x2e1   :  { %v681_v11 = vadd.f32 %v1495_v37, %v680_v9  ;;  %v726_v12 = vadd.f32 %v1495_v37, %v725_v10 }
 0x2e3   :  { %758 = vst.msk [vmem:[%s1676_s14 + $0x48] sm:$0xff] %vm52_vm0, %v681_v11 }
 0x2e4   :  { %773 = vst.msk [vmem:[%s1676_s14 + $0xc0] sm:$0xff] %vm52_vm0, %v726_v12 }
 0x2e8   :  { %v683_v13 = vpop.f32.mrf.mxu0  ;;  %v728_v14 = vpop.f32.mrf.mxu1 }
 0x2e9   :  { %v684_v15 = vadd.f32 %v1495_v37, %v683_v13  ;;  %v729_v16 = vadd.f32 %v1495_v37, %v728_v14 }
 0x2eb   :  { %759 = vst.msk [vmem:[%s1676_s14 + $0x50] sm:$0xff] %vm52_vm0, %v684_v15 }
 0x2ec   :  { %774 = vst.msk [vmem:[%s1676_s14 + $0xc8] sm:$0xff] %vm52_vm0, %v729_v16 }
 0x2f0   :  { %v686_v17 = vpop.f32.mrf.mxu0  ;;  %v731_v18 = vpop.f32.mrf.mxu1 }
 0x2f1   :  { %v687_v19 = vadd.f32 %v1495_v37, %v686_v17  ;;  %v732_v20 = vadd.f32 %v1495_v37, %v731_v18 }
 0x2f3   :  { %760 = vst.msk [vmem:[%s1676_s14 + $0x58] sm:$0xff] %vm52_vm0, %v687_v19 }
 0x2f4   :  { %775 = vst.msk [vmem:[%s1676_s14 + $0xd0] sm:$0xff] %vm52_vm0, %v732_v20 }
 0x2f8   :  { %v689_v21 = vpop.f32.mrf.mxu0  ;;  %v734_v22 = vpop.f32.mrf.mxu1 }
 0x2f9   :  { %v690_v23 = vadd.f32 %v1495_v37, %v689_v21  ;;  %v735_v24 = vadd.f32 %v1495_v37, %v734_v22 }
 0x2fb   :  { %761 = vst.msk [vmem:[%s1676_s14 + $0x60] sm:$0xff] %vm52_vm0, %v690_v23 }
 0x2fc   :  { %776 = vst.msk [vmem:[%s1676_s14 + $0xd8] sm:$0xff] %vm52_vm0, %v735_v24 }
 0x300   :  { %v692_v25 = vpop.f32.mrf.mxu0  ;;  %v737_v26 = vpop.f32.mrf.mxu1 }
 0x301   :  { %v693_v27 = vadd.f32 %v1495_v37, %v692_v25  ;;  %v738_v28 = vadd.f32 %v1495_v37, %v737_v26 }
 0x303   :  { %762 = vst.msk [vmem:[%s1676_s14 + $0x68] sm:$0xff] %vm52_vm0, %v693_v27 }
 0x304   :  { %777 = vst.msk [vmem:[%s1676_s14 + $0xe0] sm:$0xff] %vm52_vm0, %v738_v28 }
 0x308   :  { %v695_v29 = vpop.f32.mrf.mxu0  ;;  %v740_v30 = vpop.f32.mrf.mxu1 }
 0x309   :  { %v696_v31 = vadd.f32 %v1495_v37, %v695_v29  ;;  %v741_v34 = vadd.f32 %v1495_v37, %v740_v30 }
 0x30b   :  { %763 = vst.msk [vmem:[%s1676_s14 + $0x70] sm:$0xff] %vm52_vm0, %v696_v31 }
 0x30c   :  { %778 = vst.msk [vmem:[%s1676_s14 + $0xe8] sm:$0xff] %vm52_vm0, %v741_v34 }
 0x310   :  { %v698_v35 = vpop.f32.mrf.mxu0  ;;  %v743_v36 = vpop.f32.mrf.mxu1 }
 0x311   :  { %v699_v38 = vadd.f32 %v1495_v37, %v698_v35  ;;  %v744_v39 = vadd.f32 %v1495_v37, %v743_v36 }
 0x313   :  { %764 = vst.msk [vmem:[%s1676_s14 + $0x78] sm:$0xff] %vm52_vm0, %v699_v38 }
 0x314   :  { %779 = vst.msk [vmem:[%s1676_s14 + $0xf0] sm:$0xff] %vm52_vm0, %v744_v39 }
 0x318   :  { %v746_v40 = vpop.f32.mrf.mxu1 }
 0x319   :  { %v747_v41 = vadd.f32 %v1495_v37, %v746_v40 }
 0x31b   :  { %780 = vst.msk [vmem:[%s1676_s14 + $0xf8] sm:$0xff] %vm52_vm0, %v747_v41 }
 0x31c   :  { %909 = dma.done.wait [#allocation3], 32  }
 0x31d   :  { %910 = vsyncadd [#allocation3], 4294967264 }
 0x31e   :  { %804 = vsyncpa [#allocation3], 1 }

</bundles_post_ra>
